<compile_context>
chip_gen: v7x
topology: tpu7x:2x2x1
jax: 0.10.0
libtpu: 0.0.40
codegen_flags: <defaults>
</compile_context>

<pallas_src>
import math
from functools import partial

import jax
import jax.numpy as jnp
from jax.experimental import pallas as pl
from jax.experimental.pallas import tpu as pltpu


# ----------------------------- helpers --------------------------------------


def _sublane_pad(pad: int) -> int:
    """Halo rows rounded up to the 8-row sublane quantum (aligned stores)."""
    return ((pad + 7) // 8) * 8 if pad > 0 else 0


def _vmem_capacity_bytes() -> int:
    default = 64 * 1024 * 1024  # safe lower bound (v7x per-core VMEM)
    try:
        info = pltpu.get_tpu_info()
        return int(getattr(info, "vmem_capacity_bytes", default))
    except Exception:
        return default


def _conv_gate(means, w_ref, mpad_ref, k):
    """sigmoid(Conv1d(1,1,k, zero pad, no bias)) over channels.

    means: (C, 1) f32 value, channels on sublanes.
    w_ref: (k,) f32 in SMEM.
    mpad_ref: (C + 2*pad_al, 1) f32 VMEM scratch used as a zero halo so each
    of the k taps is a cheap statically-offset sublane read (no C x C matrix,
    no cross-lane gymnastics).  O(k*C) work total.
    """
    c = means.shape[0]
    pad = (k - 1) // 2
    if pad == 0:
        g = w_ref[0] * means
    else:
        pad_al = _sublane_pad(pad)
        mpad_ref[...] = jnp.zeros_like(mpad_ref)
        mpad_ref[pl.ds(pad_al, c), :] = means            # aligned sublane store
        g = w_ref[0] * mpad_ref[pl.ds(pad_al - pad, c), :]
        for j in range(1, k):
            g = g + w_ref[j] * mpad_ref[pl.ds(pad_al - pad + j, c), :]
    # exp-based sigmoid -> EUP; exact division keeps f32 bit-accuracy.
    return 1.0 / (1.0 + jnp.exp(-g))


# ----------------------------- kernels --------------------------------------


def _eca_fused_kernel(w_ref, x_ref, o_ref, mpad_ref, *, k, inv_hw):
    # One sample per grid step: x_ref (1, C, HW); 1 HBM read + 1 HBM write.
    x = x_ref[0]                                                     # (C, HW)
    means = jnp.sum(x.astype(jnp.float32), axis=-1, keepdims=True) * inv_hw
    gate = _conv_gate(means, w_ref, mpad_ref, k)                     # (C, 1) f32
    # Multiply in the input dtype (gate rounded once) -> no live f32 slab.
    o_ref[0] = x * gate.astype(o_ref.dtype)


def _eca_pool_gate_kernel(w_ref, x_ref, gate_ref, acc_ref, mpad_ref,
                          *, k, hw, inv_hw):
    # grid = (N, HW tiles).  Steady state: lane-chunked VPU adds into a
    # (C, lw) accumulator; single XLU lane-reduce + conv + sigmoid at the end.
    h = pl.program_id(1)
    t_hw = x_ref.shape[2]
    lw = acc_ref.shape[1]

    @pl.when(h == 0)
    def _():
        acc_ref[...] = jnp.zeros_like(acc_ref)

    # Mask lanes past HW (last block of a cdiv grid may be partial).
    lane = jax.lax.broadcasted_iota(jnp.int32, x_ref.shape, 2)
    xf = jnp.where(h * t_hw + lane < hw,
                   x_ref[...].astype(jnp.float32), 0.0)[0]           # (C, t_hw)

    acc = acc_ref[...]
    for i in range(t_hw // lw):
        acc = acc + xf[:, i * lw:(i + 1) * lw]
    acc_ref[...] = acc

    @pl.when(h == pl.num_programs(1) - 1)
    def _():
        means = jnp.sum(acc_ref[...], axis=-1, keepdims=True) * inv_hw  # (C, 1)
        gate_ref[0] = _conv_gate(means, w_ref, mpad_ref, k)


def _eca_scale_kernel(x_ref, g_ref, o_ref):
    # x_ref: (tr, HW), g_ref: (tr, 1) f32 -> elementwise scale in input dtype.
    o_ref[...] = x_ref[...] * g_ref[...].astype(x_ref.dtype)


# ----------------------------- wrapper --------------------------------------


def eca_forward(x: jax.Array, conv_w: jax.Array, *,
                block_bytes: int | None = None,
                force_two_pass: bool = False) -> jax.Array:
    """ECA forward.  x: (N, C, H, W) NCHW; conv_w: (k,) Conv1d weight, no bias."""
    N, C, H, W = x.shape
    HW = H * W
    NC = N * C
    dsize = jnp.dtype(x.dtype).itemsize
    conv_w = jnp.asarray(conv_w, jnp.float32).reshape(-1)
    k = int(conv_w.shape[0])
    pad = (k - 1) // 2
    pad_al = _sublane_pad(pad)
    inv_hw = 1.0 / float(HW)

    vmem_cap = _vmem_capacity_bytes()
    vmem_limit = min(int(vmem_cap * 0.8), 112 * 1024 * 1024)
    if block_bytes is None:
        # Bigger blocks on v7x (fast HBM, small VMEM per core -> amortize the
        # ~0.35us per-step overhead); 4 MiB elsewhere.
        block_bytes = (8 * 1024 * 1024 if vmem_cap <= 64 * 1024 * 1024
                       else 4 * 1024 * 1024)

    x3 = x.reshape(N, C, HW)            # contiguous reshape, no extra HBM pass
    w_spec = pl.BlockSpec(memory_space=pltpu.MemorySpace.SMEM)

    # ------------------ fused single pass (1 read + 1 write) ----------------
    slab = C * HW * dsize
    f32_extra = 0 if dsize == 4 else C * HW * 4      # transient f32 upcast
    fused_need = 4 * slab + f32_extra                 # 2x in + 2x out (dbl buf)
    if not force_two_pass and fused_need <= int(vmem_limit * 0.75):
        out3 = pl.pallas_call(
            partial(_eca_fused_kernel, k=k, inv_hw=inv_hw),
            out_shape=jax.ShapeDtypeStruct((N, C, HW), x.dtype),
            grid_spec=pltpu.PrefetchScalarGridSpec(
                num_scalar_prefetch=0,
                grid=(N,),
                in_specs=[
                    w_spec,
                    pl.BlockSpec((1, C, HW), lambda n: (n, 0, 0)),
                ],
                out_specs=pl.BlockSpec((1, C, HW), lambda n: (n, 0, 0)),
                scratch_shapes=[pltpu.VMEM((C + 2 * pad_al, 1), jnp.float32)],
            ),
            compiler_params=pltpu.CompilerParams(
                dimension_semantics=("parallel",),
                vmem_limit_bytes=vmem_limit),
            cost_estimate=pl.CostEstimate(
                flops=3 * N * C * HW + 2 * N * C * k,
                transcendentals=N * C,
                bytes_accessed=2 * N * C * HW * dsize),
        )(conv_w, x3)
        return out3.reshape(N, C, H, W)

    # ------------------ fallback: streaming two passes -----------------------
    # Pass 1: per-(n, c) mean over HW + channel conv + sigmoid -> gates (N,C,1).
    per_lane = max(1, C * dsize)
    p1_budget = int(vmem_limit * 0.6)
    budget_lanes = max(128, (p1_budget - C * 512) // max(1, C * (2 * dsize + 4)))
    max_lanes = min(block_bytes // per_lane, budget_lanes, 4096)
    if HW <= 128:
        t_hw = HW                       # last dim equals full extent -> legal
    else:
        t = max(128, min(int(max_lanes), HW))
        t_hw = (t // 128) * 128         # lane-aligned, never exceeds HW
    grid_h = pl.cdiv(HW, t_hw)
    lw = min(128, t_hw)

    gates = pl.pallas_call(
        partial(_eca_pool_gate_kernel, k=k, hw=HW, inv_hw=inv_hw),
        out_shape=jax.ShapeDtypeStruct((N, C, 1), jnp.float32),
        grid_spec=pltpu.PrefetchScalarGridSpec(
            num_scalar_prefetch=0,
            grid=(N, grid_h),
            in_specs=[
                w_spec,
                pl.BlockSpec((1, C, t_hw), lambda n, h: (n, 0, h)),
            ],
            out_specs=pl.BlockSpec((1, C, 1), lambda n, h: (n, 0, 0)),
            scratch_shapes=[pltpu.VMEM((C, lw), jnp.float32),
                            pltpu.VMEM((C + 2 * pad_al, 1), jnp.float32)],
        ),
        compiler_params=pltpu.CompilerParams(
            dimension_semantics=("parallel", "arbitrary"),
            vmem_limit_bytes=vmem_limit),
        cost_estimate=pl.CostEstimate(
            flops=N * C * HW + 2 * N * C * k,
            transcendentals=N * C,
            bytes_accessed=N * C * HW * dsize + N * C * 4),
    )(conv_w, x3)

    # Pass 2: lane-dense elementwise scale over (N*C, HW) rows, parallel grid.
    x2 = x.reshape(NC, HW)
    g2 = gates.reshape(NC, 1)
    quantum = max(8, 32 // dsize)       # sublane quantum for this dtype
    max_rows = max(1, block_bytes // max(1, HW * dsize))
    if NC <= quantum:
        tr = NC                         # equals full extent -> legal
    else:
        tr = max(quantum, (min(max_rows, NC) // quantum) * quantum)
    grid_r = pl.cdiv(NC, tr)

    out2 = pl.pallas_call(
        _eca_scale_kernel,
        out_shape=jax.ShapeDtypeStruct((NC, HW), x.dtype),
        grid_spec=pltpu.PrefetchScalarGridSpec(
            num_scalar_prefetch=0,
            grid=(grid_r,),
            in_specs=[pl.BlockSpec((tr, HW), lambda i: (i, 0)),
                      pl.BlockSpec((tr, 1), lambda i: (i, 0))],
            out_specs=pl.BlockSpec((tr, HW), lambda i: (i, 0)),
        ),
        compiler_params=pltpu.CompilerParams(
            dimension_semantics=("parallel",),
            vmem_limit_bytes=vmem_limit),
        cost_estimate=pl.CostEstimate(
            flops=NC * HW, transcendentals=0,
            bytes_accessed=2 * NC * HW * dsize + NC * 4),
    )(x2, g2)
    return out2.reshape(N, C, H, W)


# ----------------------------- reference ------------------------------------


def eca_ref(x: jax.Array, conv_w: jax.Array) -> jax.Array:
    N, C, H, W = x.shape
    k = conv_w.shape[0]
    pad = (k - 1) // 2
    means = jnp.mean(x.astype(jnp.float32), axis=(2, 3))        # (N, C)
    mp = jnp.pad(means, ((0, 0), (pad, pad)))
    g = jnp.zeros_like(means)
    for j in range(k):
        g = g + conv_w[j] * mp[:, j:j + C]
    g = jax.nn.sigmoid(g)
    return (x.astype(jnp.float32) * g[:, :, None, None]).astype(x.dtype)


if __name__ == "__main__":
    key = jax.random.PRNGKey(0)
    kx, kw, kx2, kx3 = jax.random.split(key, 4)

    # ECA-style setup: k_size=3, deterministic Conv1d weight.
    k_size = 3
    bound = 1.0 / math.sqrt(k_size)
    conv_w = jax.random.uniform(kw, (k_size,), minval=-bound, maxval=bound,
                                dtype=jnp.float32)

    # Small input -> fused single-pass path (grid over N, one read/one write).
    x = jax.random.normal(kx, (2, 4, 16, 16), dtype=jnp.float32)
    y = jax.block_until_ready(eca_forward(x, conv_w))
    y_ref = eca_ref(x, conv_w)
    assert y.shape == x.shape and y.dtype == x.dtype
    assert jnp.allclose(y, y_ref, atol=1e-5, rtol=1e-5), "fused path mismatch"

    # Force the streaming two-pass fallback with a tiny block budget so both
    # grids take multiple steps (HW accumulation + row-tiled scale).
    x2 = jax.random.normal(kx2, (2, 8, 32, 32), dtype=jnp.float32)
    y2 = jax.block_until_ready(
        eca_forward(x2, conv_w, block_bytes=8 * 1024, force_two_pass=True))
    y2_ref = eca_ref(x2, conv_w)
    assert jnp.allclose(y2, y2_ref, atol=1e-5, rtol=1e-5), "two-pass mismatch"

    # Non-multiple-of-128 spatial size (7x7) exercises the masked remainder
    # handling in the pooling pass.
    x3 = jax.random.normal(kx3, (2, 8, 7, 7), dtype=jnp.float32)
    y3 = jax.block_until_ready(eca_forward(x3, conv_w, force_two_pass=True))
    y3_ref = eca_ref(x3, conv_w)
    assert jnp.allclose(y3, y3_ref, atol=1e-5, rtol=1e-5), "masked path mismatch"

    print("KERNEL_OK")
</pallas_src>

<mosaic_0001>
module attributes {stable_mosaic.version = 11 : i64} {
  func.func @_eca_fused_kernel(%arg0: i32, %arg1: memref<3xf32, #tpu.memory_space<smem>>, %arg2: memref<1x4x256xf32, #tpu.memory_space<vmem>>, %arg3: memref<1x4x256xf32, #tpu.memory_space<vmem>>, %arg4: memref<20x1xf32, #tpu.memory_space<vmem>>) attributes {dimension_semantics = [#tpu.dimension_semantics<parallel>], iteration_bounds = array<i64: 2>, scalar_prefetch = 0 : i64, scratch_operands = 1 : i64, tpu.core_type = #tpu.core_type<tc>, window_params = [{transform_indices = @transform_0, window_bounds = array<i64: 3>}, {transform_indices = @transform_1, window_bounds = array<i64: 1, 4, 256>}, {transform_indices = @transform_2, window_bounds = array<i64: 1, 4, 256>}]} {
    %c0 = arith.constant 0 : index
    %c0_0 = arith.constant 0 : index
    %c0_1 = arith.constant 0 : index
    %0 = vector.load %arg2[%c0, %c0_0, %c0_1] : memref<1x4x256xf32, #tpu.memory_space<vmem>>, vector<1x4x256xf32>
    %1 = vector.shape_cast %0 : vector<1x4x256xf32> to vector<4x256xf32>
    %cst = arith.constant dense<0.000000e+00> : vector<4xf32>
    %2 = vector.multi_reduction <add>, %1, %cst [1] : vector<4x256xf32> to vector<4xf32>
    %3 = vector.shape_cast %2 : vector<4xf32> to vector<4x1xf32>
    %cst_2 = arith.constant 3.906250e-03 : f32
    %4 = vector.broadcast %cst_2 : f32 to vector<4x1xf32>
    %5 = arith.mulf %3, %4 : vector<4x1xf32>
    %cst_3 = arith.constant 0.000000e+00 : f32
    %6 = vector.broadcast %cst_3 : f32 to vector<20x1xf32>
    %c0_4 = arith.constant 0 : index
    %c0_5 = arith.constant 0 : index
    %7 = vector.load %arg4[%c0_4, %c0_5] : memref<20x1xf32, #tpu.memory_space<vmem>>, vector<20x1xf32>
    tpu.vector_store %arg4[%c0_4, %c0_5], %6 {strides = array<i32>} : memref<20x1xf32, #tpu.memory_space<vmem>>, vector<20x1xf32>,
    %c8 = arith.constant 8 : index
    %c0_6 = arith.constant 0 : index
    %8 = vector.load %arg4[%c8, %c0_6] : memref<20x1xf32, #tpu.memory_space<vmem>>, vector<4x1xf32>
    tpu.vector_store %arg4[%c8, %c0_6], %5 {strides = array<i32>} : memref<20x1xf32, #tpu.memory_space<vmem>>, vector<4x1xf32>,
    %c0_7 = arith.constant 0 : index
    %9 = memref.load %arg1[%c0_7] : memref<3xf32, #tpu.memory_space<smem>>
    %c7 = arith.constant 7 : index
    %c0_8 = arith.constant 0 : index
    %10 = vector.load %arg4[%c7, %c0_8] : memref<20x1xf32, #tpu.memory_space<vmem>>, vector<4x1xf32>
    %11 = vector.broadcast %9 : f32 to vector<4x1xf32>
    %12 = arith.mulf %11, %10 : vector<4x1xf32>
    %c1 = arith.constant 1 : index
    %13 = memref.load %arg1[%c1] : memref<3xf32, #tpu.memory_space<smem>>
    %c8_9 = arith.constant 8 : index
    %c0_10 = arith.constant 0 : index
    %14 = vector.load %arg4[%c8_9, %c0_10] : memref<20x1xf32, #tpu.memory_space<vmem>>, vector<4x1xf32>
    %15 = vector.broadcast %13 : f32 to vector<4x1xf32>
    %16 = arith.mulf %15, %14 : vector<4x1xf32>
    %17 = arith.addf %12, %16 : vector<4x1xf32>
    %c2 = arith.constant 2 : index
    %18 = memref.load %arg1[%c2] : memref<3xf32, #tpu.memory_space<smem>>
    %c9 = arith.constant 9 : index
    %c0_11 = arith.constant 0 : index
    %19 = vector.load %arg4[%c9, %c0_11] : memref<20x1xf32, #tpu.memory_space<vmem>>, vector<4x1xf32>
    %20 = vector.broadcast %18 : f32 to vector<4x1xf32>
    %21 = arith.mulf %20, %19 : vector<4x1xf32>
    %22 = arith.addf %17, %21 : vector<4x1xf32>
    %cst_12 = arith.constant 0.000000e+00 : f32
    %23 = vector.broadcast %cst_12 : f32 to vector<4x1xf32>
    %24 = arith.subf %23, %22 : vector<4x1xf32>
    %25 = math.exp %24 : vector<4x1xf32>
    %cst_13 = arith.constant 1.000000e+00 : f32
    %26 = vector.broadcast %cst_13 : f32 to vector<4x1xf32>
    %27 = arith.addf %26, %25 : vector<4x1xf32>
    %cst_14 = arith.constant 1.000000e+00 : f32
    %28 = vector.broadcast %cst_14 : f32 to vector<4x1xf32>
    %29 = arith.divf %28, %27 : vector<4x1xf32>
    %30 = vector.broadcast %29 : vector<4x1xf32> to vector<4x256xf32>
    %31 = arith.mulf %1, %30 : vector<4x256xf32>
    %c0_15 = arith.constant 0 : index
    %c0_16 = arith.constant 0 : index
    %c0_17 = arith.constant 0 : index
    %32 = vector.load %arg3[%c0_15, %c0_16, %c0_17] : memref<1x4x256xf32, #tpu.memory_space<vmem>>, vector<1x4x256xf32>
    %33 = vector.shape_cast %32 : vector<1x4x256xf32> to vector<4x256xf32>
    %34 = vector.shape_cast %31 : vector<4x256xf32> to vector<1x4x256xf32>
    tpu.vector_store %arg3[%c0_15, %c0_16, %c0_17], %34 {strides = array<i32>} : memref<1x4x256xf32, #tpu.memory_space<vmem>>, vector<1x4x256xf32>,
    return
  }
  func.func @transform_0(%arg0: i32) -> i32 {
    %c0_i32 = arith.constant 0 : i32
    %c0_i32_0 = arith.constant 0 : i32
    return %c0_i32 : i32
  }
  func.func @transform_1(%arg0: i32) -> (i32, i32, i32) {
    %c0_i32 = arith.constant 0 : i32
    %c0_i32_0 = arith.constant 0 : i32
    %c0_i32_1 = arith.constant 0 : i32
    return %arg0, %c0_i32, %c0_i32_0 : i32, i32, i32
  }
  func.func @transform_2(%arg0: i32) -> (i32, i32, i32) {
    %c0_i32 = arith.constant 0 : i32
    %c0_i32_0 = arith.constant 0 : i32
    %c0_i32_1 = arith.constant 0 : i32
    return %arg0, %c0_i32, %c0_i32_0 : i32, i32, i32
  }
}

</mosaic_0001>

<bundles_post_ra>
// kernel: tpu_custom_call.1
= control target key start
LH: loop header
LB: loop body
LE: loop exit
PB: predicated region body
PF: predicated region fallthrough
CT: control target
= control target key end

     0   :  { %7 = vsyncpa [#allocation6], 0  ;;  %s752_s0 = inlined_call_operand.hbm [shape: f32[3], index: 0, kind: input, shape index: {}]   ;;  %s753_s1 = inlined_call_operand.hbm [shape: f32[2,4,256], index: 1, kind: input, shape index: {}]   ;;  %s754_s2 = inlined_call_operand.hbm [shape: f32[2,4,256], index: 2, kind: output, shape index: {}]  }
   0x1   :  { %8 = vsyncpa [#allocation4], 0 }
   0x2   :  { %10 = vsyncpa [#allocation4 + $0x1], 0 }
   0x3   :  { %11 = vsyncpa [#allocation5], 0 }
   0x4   :  { %13 = vsyncpa [#allocation5 + $0x1], 0  ;;  %s542_s9 = smov 0   ;;  %s544_s10 = smov 0  }
   0x5   :  { %s546_s11 = smov 0   ;;  %s548_s12 = smov 0  }
   0x6 LB: > { %s563_s13 = sadd.s32 4294967295, %s519_s12   ;;  %s320_s14 = sadd.s32 4294967294, %s519_s12   ;;  %s519_s12 = sphi %s548_s12, %s775_s12   ;;  %s515_s11 = sphi %s546_s11, %s774_s11   ;;  %s511_s10 = sphi %s544_s10, %s773_s10   ;;  %s507_s9 = sphi %s542_s9, %s772_s9  }
   0x7   : > { %p60_p0 = scmp.ne.s32.totalorder %s511_s10, %s507_s9  ;;  %p755_p1 = scmp.eq.s32.totalorder %s563_s13, 0 }
   0x8   : > { %p90_p3 = scmp.eq.s32.totalorder %s320_s14, 1  ;;  %p321_p5 = scmp.ge.s32.totalorder %s519_s12, 1 }
   0x9   : > { %p572_p4 = por %p755_p1, %p60_p0  ;;  %p97_p7 = scmp.lt.s32.totalorder %s519_s12, 3 }
   0xa   : > { %p577_p6 = por %p90_p3, %p60_p0  ;;  %s588_s18 = sadd.s32 1, %s519_s12  }
   0xb   : > { %s758_s15 = scalar_select %p572_p4, 1, 0 }
   0xc   : > { %s759_s16 = scalar_select %p577_p6, 1, 0 }
   0xd   : > { %p582_p8 = pnand %p321_p5, %p97_p7  ;;  %s44_s19 = ssub.s32 %s519_s12, %s588_s18 }
   0xe   : > { %s47_s20 = sadd.s32 1, %s515_s11  ;;  %p601_p12 = scmp.eq.s32.totalorder %s44_s19, 0 }
   0xf   : > { %p348_p10 = pneg %p582_p8  ;;  %p54_p13 = scmp.ne.s32.totalorder %s515_s11, %s511_s10 }
  0x10   : > { %p55_p0 = scmp.eq.s32.totalorder %s519_s12, 0  ;;  %p361_p3 = scmp.lt.s32.totalorder %s519_s12, 2 }
  0x11   : > { %p597_p11 = pnand %p348_p10, %p755_p1  ;;  %s406_s25 = scalar_lea.hbm %s752_s0, 16 }
  0x12   : > { %p407_p5 = scmp.ne.s32.totalorder %s752_s0, %s406_s25  ;;  %p413_p1 = scmp.lt.u32.totalorder %s406_s25, %s752_s0 }
  0x13   : > { %p408_p7 = pneg %p597_p11 }
  0x15   : > { %p409_p10 = pnand %p408_p7, %p407_p5 }
  0x17   : > { %p410_p9 = pneg %p409_p10 }
  0x19   : > { %p415_p2 = pnand %p413_p1, %p410_p9 }
  0x1b   : > { %418 = shalt.err (!%p415_p2)
}
  0x1c   : > { %s521_s30 = smov [#allocation3]   ;;  %p56_p1 = por %p55_p0, %p54_p13 }
  0x1d   : > { %351 = dma.hbm_to_smem (!%p597_p11), %s752_s0, 16, %s521_s30, [#allocation6]  }
  0x1e   : > { %s628_s5 = scalar_select %p601_p12, %s515_s11, %s47_s20  }
  0x1f   : > { %p763_p2 = scmp.eq.s32.totalorder %s563_s13, 1  ;;  %s119_s7 = sand.u32 1, %s515_s11  }
  0x20   : > { %s338_s8 = sshll.u32 %s519_s12, 7  ;;  %s324_s14 = sshll.u32 %s119_s7, 3 }
  0x21   : > { %p640_p9 = por %p763_p2, %p54_p13  ;;  %s649_s23 = scalar_lea.hbm %s753_s1, %s338_s8 }
  0x22   : > { %s123_s20 = scalar_lea.vmem [#allocation7], %s324_s14  ;;  %p653_p11 = pnand %p361_p3, %p56_p1 }
  0x23   : > { %s764_s6 = scalar_select %p640_p9, 1, 0 }
  0x24   : > { %s131_s22 = sshll.u32 %s123_s20, 4  ;;  %s120_s25 = scalar_lea.sflag [#allocation4], %s119_s7  ;;  %s657_s22 = int_to_ptr.vmem [resolvable:$true] %s131_s22 }
  0x25   : > { %s419_s26 = scalar_lea.hbm %s649_s23, 128  ;;  %p421_p13 = pneg %p653_p11 }
  0x26   : > { %p420_p12 = scmp.ne.s32.totalorder %s649_s23, %s419_s26  ;;  %s424_s29 = scalar_lea.hbm %s753_s1, 256 }
  0x27   : > { %p425_p3 = scmp.lt.u32.totalorder %s649_s23, %s753_s1  ;;  %p426_p7 = scmp.lt.u32.totalorder %s424_s29, %s419_s26 }
  0x28   : > { %p422_p0 = pnand %p421_p13, %p420_p12  ;;  %p428_p1 = scmp.lt.u32.totalorder %s419_s26, %s649_s23 }
  0x29   : > { %p427_p10 = por %p426_p7, %p425_p3 }
  0x2a   : > { %p423_p5 = pneg %p422_p0 }
  0x2b   : > { %p429_p2 = por %p428_p1, %p427_p10 }
  0x2d   : > { %p430_p6 = pnand %p429_p2, %p423_p5 }
  0x2f   : > { %433 = shalt.err (!%p430_p6)
}
  0x30   : > { %s434_s4 = scalar_lea.vmem %s657_s22, 128  ;;  %s522_s7 = smov [#allocation7]  }
  0x31   : > { %p435_p12 = scmp.ne.s32.totalorder %s657_s22, %s434_s4  ;;  %s439_s8 = sshll.u32 %s522_s7, 4  ;;  %s440_s8 = int_to_ptr.vmem [resolvable:$false] %s439_s8 }
  0x32   : > { %s441_s14 = scalar_lea.vmem %s440_s8, 256  ;;  %p442_p4 = scmp.lt.s32.totalorder %s657_s22, %s440_s8 }
  0x33   : > { %p437_p0 = pnand %p435_p12, %p421_p13  ;;  %p443_p3 = scmp.lt.s32.totalorder %s441_s14, %s434_s4 }
  0x35   : > { %p438_p9 = pneg %p437_p0  ;;  %p444_p7 = por %p443_p3, %p442_p4 }
  0x37   : > { %p445_p10 = pnand %p444_p7, %p438_p9 }
  0x39   : > { %448 = shalt.err (!%p445_p10)
}
  0x3a   : > { %355 = dma.hbm_to_vmem [thread:$0]  (!%p653_p11), %s649_s23, 128, %s657_s22, %s120_s25  }
  0x3b   : > { %140 = sbr.rel (%p582_p8) target bundleno = 412 (0x19c), region = 28  ;;  %p766_p6 = scmp.eq.s32.totalorder (!%p582_p8), %s563_s13, 0 }
  0x42   : > { %494 = dma.done.wait (%p766_p6), [#allocation6], 16   ;;  %p767_p13 = pmov %p766_p6 }
  0x43   : > { %s691_s19 = sand.u32 1, %s511_s10   ;;  %p768_p4 = scmp.ne.s32.totalorder %s758_s15, 0 }
  0x44   : > { %496 = vsyncadd (%p767_p13), [#allocation6], 4294967280  ;;  %s329_s21 = sshll.u32 %s691_s19, 3  ;;  %s147_s20 = scalar_lea.sflag [#allocation4], %s691_s19 }
  0x45   : > { %s150_s23 = scalar_lea.vmem [#allocation7], %s329_s21 }
  0x46   : > { %498 = dma.done.wait (%p768_p4), %s147_s20, 128  }
  0x47   : > { %500 = vsyncadd (%p768_p4), %s147_s20, 4294967168 }
  0x48   : > { %155 = sfence }
  0x49   : > { %v172_v0 = vld [vmem:[%s150_s23] sm:$0xff]  ;;  %vm176_vm0 = vcmask 1043456   ;;  %vm183_vm1 = vcmask 7168   ;;  %vm186_vm2 = vcmask 3072   ;;  %v523_v3 = vmov 0.0   ;;  %s189_s17 = sld [smem:[#allocation3]] }
  0x4a   : > { %v174_v1 = vcombine.high %v172_v0, %v172_v0  ;;  %v177_v2 = vsel %vm176_vm0, %v172_v0, 0.0  ;;  %184 = vst.msk [vmem:[#allocation2] sm:$0xff] %vm183_vm1, %v523_v3  ;;  %185 = vst.msk [vmem:[#allocation2 + $0x8] sm:$0xff] %vm183_vm1, %v523_v3  ;;  %v524_v6 = vmov 0   ;;  %s331_s22 = sld [smem:[#allocation3 + $0x1]]  ;;  %s332_s15 = sld [smem:[#allocation3 + $0x2]]  ;;  %v216_v27 = vlaneseq }
  0x4b   : > { %400 = vset.pattern.permute.xlu0 %v524_v6  ;;  %v525_v25 = vmov 839922192   ;;  %s339_s24 = sshll.u32 %s563_s13, 7  ;;  %s171_s25 = scalar_lea.vmem [#allocation8], %s329_s21 }
  0x4c   : > { %v178_v4 = vsel %vm176_vm0, %v174_v1, 0.0  ;;  %v214_v26 = vunpack.c.l.s4 %v525_v25  ;;  %v217_v29 = vshrl.u32 %v216_v27, 7  ;;  %s238_s26 = sshll.u32 %s171_s25, 4  ;;  %s708_s29 = scalar_lea.hbm %s754_s2, %s339_s24  ;;  %s710_s26 = int_to_ptr.vmem [resolvable:$true] %s238_s26 }
  0x4d   : > { %v179_v5 = vadd.f32 %v178_v4, %v177_v2  ;;  %s224_s30 = scalar_lea.sflag [#allocation5], %s691_s19  ;;  %s449_s3 = scalar_lea.vmem %s710_s26, 128 }
  0x4e   : > { %v215_v28 = vunpack.c.0.s8 %v214_v26  ;;  %p450_p8 = scmp.ne.s32.totalorder %s710_s26, %s449_s3  ;;  %p769_p9 = scmp.ne.s32.totalorder %s764_s6, 0 }
  0x4f   : > { %180 = vadd.xlane.f32.xlu0 %v179_v5  ;;  %v191_v9 = vstv %s189_s17  ;;  %s526_s13 = smov [#allocation8]  }
  0x50   : > { %v195_v10 = vstv %s331_s22  ;;  %v200_v14 = vstv %s332_s15  ;;  %v218_v30 = vsub.s32 %v215_v28, %v217_v29  ;;  %p451_p11 = pnand %p450_p8, %p769_p9  ;;  %s453_s4 = sshll.u32 %s526_s13, 4  ;;  %s454_s4 = int_to_ptr.vmem [resolvable:$false] %s453_s4 }
  0x51   : > { %s455_s7 = scalar_lea.vmem %s454_s4, 256  ;;  %p456_p1 = scmp.lt.s32.totalorder %s710_s26, %s454_s4 }
  0x52   : > { %p452_p5 = pneg %p451_p11  ;;  %p457_p2 = scmp.lt.s32.totalorder %s455_s7, %s449_s3 }
  0x54   : > { %p458_p12 = por %p457_p2, %p456_p1 }
  0x56   : > { %p459_p0 = pnand %p458_p12, %p452_p5 }
  0xdc   : > { %v181_v7 = vpop.xlane.xlu0 %180 }
  0xdd   : > { %v182_v8 = vmul.f32 0.00390625, %v181_v7 }
  0xdf   : > { %188 = vst.msk [vmem:[#allocation2 + $0x8] sm:$0xf] %vm186_vm2, %v182_v8 }
  0xe6   : > { %v190_v11 = vld [vmem:[#allocation2 + $0x7] sm:$0xf] }
  0xe7   : > { %v194_v12 = vld [vmem:[#allocation2 + $0x8] sm:$0xf]  ;;  %v192_v15 = vmul.f32 %v191_v9, %v190_v11 }
  0xe8   : > { %v199_v13 = vld [vmem:[#allocation2 + $0x9] sm:$0xf]  ;;  %v196_v16 = vmul.f32 %v195_v10, %v194_v12 }
  0xe9   : > { %v201_v18 = vmul.f32 %v200_v14, %v199_v13 }
  0xea   : > { %v197_v17 = vadd.f32 %v196_v16, %v192_v15 }
  0xec   : > { %v202_v19 = vadd.f32 %v201_v18, %v197_v17 }
  0xee   : > { %v203_v20 = vsub.f32 0.0, %v202_v19 }
  0xf0   : > { %v204_v21 = vmul.f32 1.442695, %v203_v20 }
  0xf2   : > { %402 = vpow2.f32 %v204_v21 }
  0xfc   : > { %v403_v22 = vpop.eup %402 }
  0xfd   : > { %v206_v23 = vadd.f32 1.0, %v403_v22 }
  0xff   : > { %404 = vrcp.f32 %v206_v23 }
 0x109   : > { %v405_v24 = vpop.eup %404 }
 0x10a   : > { %211 = vperm.xlu0 %400, %v405_v24  }
 0x189   : > { %v212_v31 = vpop.permute.xlu0 %211 }
 0x18a   : > { %v219_v32 = vrot.slane %v212_v31, %v218_v30 }
 0x18c   : > { %v221_v33 = vmul.f32 %v219_v32, %v172_v0 }
 0x18e   : > { %222 = vst [vmem:[%s171_s25] sm:$0xff] %v221_v33 }
 0x18f   : > { %462 = shalt.err (!%p459_p0)
}
 0x190   : > { %s463_s8 = scalar_lea.hbm %s708_s29, 128  ;;  %s467_s21 = scalar_lea.hbm %s754_s2, 256 }
 0x191   : > { %p464_p3 = scmp.ne.s32.totalorder %s708_s29, %s463_s8  ;;  %p468_p6 = scmp.lt.u32.totalorder %s708_s29, %s754_s2 }
 0x192   : > { %p469_p13 = scmp.lt.u32.totalorder %s467_s21, %s463_s8  ;;  %p471_p8 = scmp.lt.u32.totalorder %s463_s8, %s708_s29 }
 0x193   : > { %p465_p7 = pnand %p464_p3, %p769_p9 }
 0x194   : > { %p470_p4 = por %p469_p13, %p468_p6 }
 0x195   : > { %p466_p10 = pneg %p465_p7 }
 0x196   : > { %p472_p11 = por %p471_p8, %p470_p4 }
 0x198   : > { %p473_p5 = pnand %p472_p11, %p466_p10 }
 0x19a   : > { %476 = shalt.err (!%p473_p5)
}
 0x19b   : > { %346 = dma.vmem_to_hbm [thread:$0]  (%p769_p9), %s710_s26, 128, %s708_s29, %s224_s30  }
 0x19c PF: > { %s250_s17 = sand.u32 1, %s507_s9   ;;  %p770_p1 = scmp.ne.s32.totalorder %s759_s16, 0 }
 0x19d   : > { %p771_p2 = scmp.ge.s32.totalorder %s519_s12, 2  ;;  %s251_s22 = scalar_lea.sflag [#allocation5], %s250_s17 }
 0x19f   : > { %p357_p12 = pnand %p771_p2, %p770_p1 }
 0x1a1   : > { %502 = dma.done.wait (!%p357_p12), %s251_s22, 128  }
 0x1a2   : > { %504 = vsyncadd (!%p357_p12), %s251_s22, 4294967168  ;;  %p16_p0 = scmp.ge.s32.totalorder %s588_s18, 4   ;;  %s772_s9 = smov %s511_s10 }
 0x1a3   : > { %s773_s10 = smov %s515_s11  ;;  %s774_s11 = smov %s628_s5 }
 0x1a4   : > { %s775_s12 = smov %s588_s18  ;;  %18 = sbr.rel (!%p16_p0) target bundleno = 6 (0x6), region = 78 }
 0x1ab   :  { %256 = vsyncpa [#allocation4], 1 }
 0x1ac   :  { %258 = vsyncpa [#allocation4 + $0x1], 1 }
 0x1ad   :  { %259 = vsyncpa [#allocation5], 1 }
 0x1ae   :  { %261 = vsyncpa [#allocation5 + $0x1], 1 }
 0x1af   :  { %262 = vsyncpa [#allocation6], 1 }
 0x1b0   :  { %264 = vsyncpa [#allocation6 + $0x1], 1 }

</bundles_post_ra>
